<compile_context>
chip_gen: v5e
topology: v5e:2x2
jax: 0.10.0
libtpu: 0.0.40
codegen_flags: <defaults>
</compile_context>

<pallas_src>
from functools import partial

import jax
import jax.numpy as jnp
from jax.experimental import pallas as pl
from jax.experimental.pallas import tpu as pltpu

HIDDEN1 = 256
HIDDEN2 = 128


def _round_up(x, m):
    return (x + m - 1) // m * m


def _cdiv(a, b):
    return (a + b - 1) // b


def _fused_actor_critic_kernel(x_ref, w1_ref, b1_ref,
                               w2p_ref, w2v_ref, b2_ref,
                               w3p_ref, w3v_ref, b3_ref, out_ref):
    # In-kernel cast: x arrives f32, MXU runs bf16 with f32 accumulation.
    x = x_ref[...].astype(jnp.bfloat16)

    # Layer 1: x (tb, ns) @ [p_w1 | v_w1] (ns, 512)  (+ fused bias, relu).
    h1 = jnp.dot(x, w1_ref[...], preferred_element_type=jnp.float32) + b1_ref[...]
    h1 = jnp.maximum(h1, 0.0).astype(jnp.bfloat16)          # (tb, 512)

    # Layer 2: two dense 256x128 matmuls on lane-aligned halves of h1
    # (no zero-padded block-diagonal -> half the MXU FLOPs of the fused form).
    h2p = (jnp.dot(h1[:, :HIDDEN1], w2p_ref[...],
                   preferred_element_type=jnp.float32) + b2_ref[:, :HIDDEN2])
    h2v = (jnp.dot(h1[:, HIDDEN1:], w2v_ref[...],
                   preferred_element_type=jnp.float32) + b2_ref[:, HIDDEN2:])
    h2p = jnp.maximum(h2p, 0.0).astype(jnp.bfloat16)         # (tb, 128)
    h2v = jnp.maximum(h2v, 0.0).astype(jnp.bfloat16)         # (tb, 128)

    # Layer 3: two 128x128 matmuls summed in f32 (same FLOPs as the fused
    # 256x128 block-diagonal, but avoids an in-kernel concatenate).
    out = (jnp.dot(h2p, w3p_ref[...], preferred_element_type=jnp.float32)
           + jnp.dot(h2v, w3v_ref[...], preferred_element_type=jnp.float32)
           + b3_ref[...])

    # Lane-dense bf16 store (single unmasked vst stream, half the writeback).
    out_ref[...] = out.astype(out_ref.dtype)


def _pick_batch_tile(batch):
    """Batch tile: <= 1024 rows (fits v5e's 16 MiB scoped VMEM comfortably);
    >= 2 tiles for batch > 256 so both v7x TensorCores get work."""
    if batch <= 256:
        return _round_up(max(batch, 1), 8)
    return min(1024, _round_up(_cdiv(batch, 2), 8))


@partial(jax.jit, static_argnames=("num_actions",))
def actor_critic_forward(x, fused, num_actions):
    """Returns (p_mean, p_std, v).

    TODO(synk): torch.distributions.Normal has no Pallas equivalent; we return
    its (loc, scale) parameters instead (scale is input-independent and is
    computed outside the kernel).
    """
    batch, num_states = x.shape
    out_cols = fused["b3"].shape[1]

    tb = _pick_batch_tile(batch)
    grid = (_cdiv(batch, tb),)
    padded = grid[0] * tb
    if padded != batch:
        x = jnp.pad(x, ((0, padded - batch), (0, 0)))

    def resident(arr):
        # Full-block weight/bias spec: constant index_map -> block stays
        # resident in VMEM across batch tiles (no re-fetch).
        return pl.BlockSpec(arr.shape, lambda i: (0, 0))

    out = pl.pallas_call(
        _fused_actor_critic_kernel,
        out_shape=jax.ShapeDtypeStruct((padded, out_cols), jnp.bfloat16),
        grid=grid,
        in_specs=[
            pl.BlockSpec((tb, num_states), lambda i: (i, 0)),
            resident(fused["w1"]), resident(fused["b1"]),
            resident(fused["w2p"]), resident(fused["w2v"]), resident(fused["b2"]),
            resident(fused["w3p"]), resident(fused["w3v"]), resident(fused["b3"]),
        ],
        out_specs=pl.BlockSpec((tb, out_cols), lambda i: (i, 0)),
        compiler_params=pltpu.CompilerParams(
            dimension_semantics=("parallel",)),
    )(x, fused["w1"], fused["b1"],
      fused["w2p"], fused["w2v"], fused["b2"],
      fused["w3p"], fused["w3v"], fused["b3"])

    out = out[:batch]
    p_mean = out[:, :num_actions]
    v = out[:, num_actions:num_actions + 1]
    # Input-independent scale, computed once in plain XLA (fused under jit).
    p_std = jnp.broadcast_to(jnp.exp(fused["log_std"]), p_mean.shape)
    return p_mean, p_std, v


def xavier_uniform(key, fan_in, fan_out):
    """Matches torch.nn.init.xavier_uniform_ for a (out, in) weight, but
    materialized directly in (in, out) layout so the kernel does y = x @ W + b."""
    bound = jnp.sqrt(6.0 / (fan_in + fan_out))
    return jax.random.uniform(
        key, (fan_in, fan_out), dtype=jnp.float32, minval=-bound, maxval=bound
    )


def init_params(key, num_states, num_actions):
    keys = jax.random.split(key, 6)
    return {
        # Policy
        "p_w1": xavier_uniform(keys[0], num_states, HIDDEN1),
        "p_b1": jnp.zeros((1, HIDDEN1), jnp.float32),
        "p_w2": xavier_uniform(keys[1], HIDDEN1, HIDDEN2),
        "p_b2": jnp.zeros((1, HIDDEN2), jnp.float32),
        "p_w3": xavier_uniform(keys[2], HIDDEN2, num_actions),
        "p_b3": jnp.zeros((1, num_actions), jnp.float32),
        "log_std": jnp.zeros((1, num_actions), jnp.float32),
        # Value
        "v_w1": xavier_uniform(keys[3], num_states, HIDDEN1),
        "v_b1": jnp.zeros((1, HIDDEN1), jnp.float32),
        "v_w2": xavier_uniform(keys[4], HIDDEN1, HIDDEN2),
        "v_b2": jnp.zeros((1, HIDDEN2), jnp.float32),
        "v_w3": xavier_uniform(keys[5], HIDDEN2, 1),
        "v_b3": jnp.zeros((1, 1), jnp.float32),
    }


def fuse_params(p, num_actions):
    """One-time host-side fusion:
      * layer 1: concat policy/value weights along lanes,
      * layer 2: keep the two dense (256,128) halves (no zero block-diagonal),
      * layer 3: two (128, out_cols) weights whose outputs sum in the kernel,
        with the policy head in columns [:num_actions] and the value head in
        column [num_actions] of a 128-lane-padded output slab,
      * weights cast to bf16 (biases stay f32, added after f32 accumulation)."""
    na1 = num_actions + 1
    out_cols = _round_up(na1, 128)

    w1 = jnp.concatenate([p["p_w1"], p["v_w1"]], axis=1)          # (ns, 512)
    b1 = jnp.concatenate([p["p_b1"], p["v_b1"]], axis=1)          # (1, 512)
    b2 = jnp.concatenate([p["p_b2"], p["v_b2"]], axis=1)          # (1, 256)

    w3p = jnp.zeros((HIDDEN2, out_cols), jnp.float32)
    w3p = w3p.at[:, :num_actions].set(p["p_w3"])                  # (128, 128)
    w3v = jnp.zeros((HIDDEN2, out_cols), jnp.float32)
    w3v = w3v.at[:, num_actions:na1].set(p["v_w3"])               # (128, 128)
    b3 = jnp.zeros((1, out_cols), jnp.float32)
    b3 = b3.at[:, :num_actions].set(p["p_b3"])
    b3 = b3.at[:, num_actions:na1].set(p["v_b3"])

    return {
        "w1": w1.astype(jnp.bfloat16),
        "b1": b1,
        "w2p": p["p_w2"].astype(jnp.bfloat16),                    # (256, 128)
        "w2v": p["v_w2"].astype(jnp.bfloat16),                    # (256, 128)
        "b2": b2,
        "w3p": w3p.astype(jnp.bfloat16),
        "w3v": w3v.astype(jnp.bfloat16),
        "b3": b3,
        "log_std": p["log_std"],
    }


def reference_forward(x, p):
    h = jax.nn.relu(x @ p["p_w1"] + p["p_b1"])
    h = jax.nn.relu(h @ p["p_w2"] + p["p_b2"])
    p_mean = h @ p["p_w3"] + p["p_b3"]
    p_std = jnp.broadcast_to(jnp.exp(p["log_std"]), p_mean.shape)
    hv = jax.nn.relu(x @ p["v_w1"] + p["v_b1"])
    hv = jax.nn.relu(hv @ p["v_w2"] + p["v_b2"])
    v = hv @ p["v_w3"] + p["v_b3"]
    return p_mean, p_std, v


if __name__ == "__main__":
    num_states = 32
    num_actions = 8
    batch = 4

    key = jax.random.PRNGKey(0)
    k_x, k_params = jax.random.split(key)

    x = jax.random.normal(k_x, (batch, num_states), dtype=jnp.float32)
    params = init_params(k_params, num_states, num_actions)
    fused = fuse_params(params, num_actions)

    p_mean, p_std, v = actor_critic_forward(x, fused, num_actions=num_actions)
    jax.block_until_ready((p_mean, p_std, v))

    # Sanity check against the plain-JAX f32 reference
    # (bf16 weights + bf16 output slab => looser tolerance).
    ref_mean, ref_std, ref_v = reference_forward(x, params)
    assert jnp.allclose(p_mean.astype(jnp.float32), ref_mean, atol=3e-2, rtol=3e-2)
    assert jnp.allclose(p_std, ref_std, atol=1e-5, rtol=1e-5)
    assert jnp.allclose(v.astype(jnp.float32), ref_v, atol=3e-2, rtol=3e-2)

    print("KERNEL_OK")
</pallas_src>

<mosaic_0001>
module attributes {stable_mosaic.version = 11 : i64} {
  func.func @_fused_actor_critic_kernel(%arg0: i32, %arg1: memref<8x32xf32, #tpu.memory_space<vmem>>, %arg2: memref<32x512xbf16, #tpu.memory_space<vmem>>, %arg3: memref<1x512xf32, #tpu.memory_space<vmem>>, %arg4: memref<256x128xbf16, #tpu.memory_space<vmem>>, %arg5: memref<256x128xbf16, #tpu.memory_space<vmem>>, %arg6: memref<1x256xf32, #tpu.memory_space<vmem>>, %arg7: memref<128x128xbf16, #tpu.memory_space<vmem>>, %arg8: memref<128x128xbf16, #tpu.memory_space<vmem>>, %arg9: memref<1x128xf32, #tpu.memory_space<vmem>>, %arg10: memref<8x128xbf16, #tpu.memory_space<vmem>>) attributes {dimension_semantics = [#tpu.dimension_semantics<parallel>], iteration_bounds = array<i64: 1>, scalar_prefetch = 0 : i64, scratch_operands = 0 : i64, tpu.core_type = #tpu.core_type<tc>, window_params = [{transform_indices = @transform_0, window_bounds = array<i64: 8, 32>}, {pipeline_mode = #tpu.pipeline_mode<synchronous>, transform_indices = @transform_1, window_bounds = array<i64: 32, 512>}, {pipeline_mode = #tpu.pipeline_mode<synchronous>, transform_indices = @transform_2, window_bounds = array<i64: 1, 512>}, {pipeline_mode = #tpu.pipeline_mode<synchronous>, transform_indices = @transform_3, window_bounds = array<i64: 256, 128>}, {pipeline_mode = #tpu.pipeline_mode<synchronous>, transform_indices = @transform_4, window_bounds = array<i64: 256, 128>}, {pipeline_mode = #tpu.pipeline_mode<synchronous>, transform_indices = @transform_5, window_bounds = array<i64: 1, 256>}, {pipeline_mode = #tpu.pipeline_mode<synchronous>, transform_indices = @transform_6, window_bounds = array<i64: 128, 128>}, {pipeline_mode = #tpu.pipeline_mode<synchronous>, transform_indices = @transform_7, window_bounds = array<i64: 128, 128>}, {pipeline_mode = #tpu.pipeline_mode<synchronous>, transform_indices = @transform_8, window_bounds = array<i64: 1, 128>}, {transform_indices = @transform_9, window_bounds = array<i64: 8, 128>}]} {
    %c0 = arith.constant 0 : index
    %c0_0 = arith.constant 0 : index
    %0 = vector.load %arg1[%c0, %c0_0] : memref<8x32xf32, #tpu.memory_space<vmem>>, vector<8x32xf32>
    %1 = arith.truncf %0 : vector<8x32xf32> to vector<8x32xbf16>
    %c0_1 = arith.constant 0 : index
    %c0_2 = arith.constant 0 : index
    %2 = vector.load %arg2[%c0_1, %c0_2] : memref<32x512xbf16, #tpu.memory_space<vmem>>, vector<32x512xbf16>
    %cst = arith.constant dense<0.000000e+00> : vector<8x512xf32>
    %3 = tpu.matmul %1, %2, %cst {dimension_numbers = #tpu.dot_dimension_numbers<[1], [0], [0], [1], [0, 0, 1, 1], [], []>} : vector<8x32xbf16>, vector<32x512xbf16>, vector<8x512xf32> -> vector<8x512xf32>
    %c0_3 = arith.constant 0 : index
    %c0_4 = arith.constant 0 : index
    %4 = vector.load %arg3[%c0_3, %c0_4] : memref<1x512xf32, #tpu.memory_space<vmem>>, vector<1x512xf32>
    %5 = vector.broadcast %4 : vector<1x512xf32> to vector<8x512xf32>
    %6 = arith.addf %3, %5 : vector<8x512xf32>
    %cst_5 = arith.constant 0.000000e+00 : f32
    %7 = vector.broadcast %cst_5 : f32 to vector<8x512xf32>
    %8 = arith.maximumf %6, %7 : vector<8x512xf32>
    %9 = arith.truncf %8 : vector<8x512xf32> to vector<8x512xbf16>
    %10 = vector.extract_strided_slice %9 {offsets = [0, 0], sizes = [8, 256], strides = [1, 1]} : vector<8x512xbf16> to vector<8x256xbf16>
    %c0_6 = arith.constant 0 : index
    %c0_7 = arith.constant 0 : index
    %11 = vector.load %arg4[%c0_6, %c0_7] : memref<256x128xbf16, #tpu.memory_space<vmem>>, vector<256x128xbf16>
    %cst_8 = arith.constant dense<0.000000e+00> : vector<8x128xf32>
    %12 = tpu.matmul %10, %11, %cst_8 {dimension_numbers = #tpu.dot_dimension_numbers<[1], [0], [0], [1], [0, 0, 1, 1], [], []>} : vector<8x256xbf16>, vector<256x128xbf16>, vector<8x128xf32> -> vector<8x128xf32>
    %c0_9 = arith.constant 0 : index
    %c0_10 = arith.constant 0 : index
    %13 = vector.load %arg6[%c0_9, %c0_10] : memref<1x256xf32, #tpu.memory_space<vmem>>, vector<1x128xf32>
    %14 = vector.broadcast %13 : vector<1x128xf32> to vector<8x128xf32>
    %15 = arith.addf %12, %14 : vector<8x128xf32>
    %16 = vector.extract_strided_slice %9 {offsets = [0, 256], sizes = [8, 256], strides = [1, 1]} : vector<8x512xbf16> to vector<8x256xbf16>
    %c0_11 = arith.constant 0 : index
    %c0_12 = arith.constant 0 : index
    %17 = vector.load %arg5[%c0_11, %c0_12] : memref<256x128xbf16, #tpu.memory_space<vmem>>, vector<256x128xbf16>
    %cst_13 = arith.constant dense<0.000000e+00> : vector<8x128xf32>
    %18 = tpu.matmul %16, %17, %cst_13 {dimension_numbers = #tpu.dot_dimension_numbers<[1], [0], [0], [1], [0, 0, 1, 1], [], []>} : vector<8x256xbf16>, vector<256x128xbf16>, vector<8x128xf32> -> vector<8x128xf32>
    %c0_14 = arith.constant 0 : index
    %c128 = arith.constant 128 : index
    %19 = vector.load %arg6[%c0_14, %c128] : memref<1x256xf32, #tpu.memory_space<vmem>>, vector<1x128xf32>
    %20 = vector.broadcast %19 : vector<1x128xf32> to vector<8x128xf32>
    %21 = arith.addf %18, %20 : vector<8x128xf32>
    %cst_15 = arith.constant 0.000000e+00 : f32
    %22 = vector.broadcast %cst_15 : f32 to vector<8x128xf32>
    %23 = arith.maximumf %15, %22 : vector<8x128xf32>
    %24 = arith.truncf %23 : vector<8x128xf32> to vector<8x128xbf16>
    %cst_16 = arith.constant 0.000000e+00 : f32
    %25 = vector.broadcast %cst_16 : f32 to vector<8x128xf32>
    %26 = arith.maximumf %21, %25 : vector<8x128xf32>
    %27 = arith.truncf %26 : vector<8x128xf32> to vector<8x128xbf16>
    %c0_17 = arith.constant 0 : index
    %c0_18 = arith.constant 0 : index
    %28 = vector.load %arg7[%c0_17, %c0_18] : memref<128x128xbf16, #tpu.memory_space<vmem>>, vector<128x128xbf16>
    %cst_19 = arith.constant dense<0.000000e+00> : vector<8x128xf32>
    %29 = tpu.matmul %24, %28, %cst_19 {dimension_numbers = #tpu.dot_dimension_numbers<[1], [0], [0], [1], [0, 0, 1, 1], [], []>} : vector<8x128xbf16>, vector<128x128xbf16>, vector<8x128xf32> -> vector<8x128xf32>
    %c0_20 = arith.constant 0 : index
    %c0_21 = arith.constant 0 : index
    %30 = vector.load %arg8[%c0_20, %c0_21] : memref<128x128xbf16, #tpu.memory_space<vmem>>, vector<128x128xbf16>
    %cst_22 = arith.constant dense<0.000000e+00> : vector<8x128xf32>
    %31 = tpu.matmul %27, %30, %cst_22 {dimension_numbers = #tpu.dot_dimension_numbers<[1], [0], [0], [1], [0, 0, 1, 1], [], []>} : vector<8x128xbf16>, vector<128x128xbf16>, vector<8x128xf32> -> vector<8x128xf32>
    %32 = arith.addf %29, %31 : vector<8x128xf32>
    %c0_23 = arith.constant 0 : index
    %c0_24 = arith.constant 0 : index
    %33 = vector.load %arg9[%c0_23, %c0_24] : memref<1x128xf32, #tpu.memory_space<vmem>>, vector<1x128xf32>
    %34 = vector.broadcast %33 : vector<1x128xf32> to vector<8x128xf32>
    %35 = arith.addf %32, %34 : vector<8x128xf32>
    %36 = arith.truncf %35 : vector<8x128xf32> to vector<8x128xbf16>
    %c0_25 = arith.constant 0 : index
    %c0_26 = arith.constant 0 : index
    %37 = vector.load %arg10[%c0_25, %c0_26] : memref<8x128xbf16, #tpu.memory_space<vmem>>, vector<8x128xbf16>
    tpu.vector_store %arg10[%c0_25, %c0_26], %36 {strides = array<i32>} : memref<8x128xbf16, #tpu.memory_space<vmem>>, vector<8x128xbf16>,
    return
  }
  func.func @transform_0(%arg0: i32) -> (i32, i32) {
    %c0_i32 = arith.constant 0 : i32
    %c0_i32_0 = arith.constant 0 : i32
    return %arg0, %c0_i32 : i32, i32
  }
  func.func @transform_1(%arg0: i32) -> (i32, i32) {
    %c0_i32 = arith.constant 0 : i32
    %c0_i32_0 = arith.constant 0 : i32
    %c0_i32_1 = arith.constant 0 : i32
    return %c0_i32, %c0_i32_0 : i32, i32
  }
  func.func @transform_2(%arg0: i32) -> (i32, i32) {
    %c0_i32 = arith.constant 0 : i32
    %c0_i32_0 = arith.constant 0 : i32
    %c0_i32_1 = arith.constant 0 : i32
    return %c0_i32, %c0_i32_0 : i32, i32
  }
  func.func @transform_3(%arg0: i32) -> (i32, i32) {
    %c0_i32 = arith.constant 0 : i32
    %c0_i32_0 = arith.constant 0 : i32
    %c0_i32_1 = arith.constant 0 : i32
    return %c0_i32, %c0_i32_0 : i32, i32
  }
  func.func @transform_4(%arg0: i32) -> (i32, i32) {
    %c0_i32 = arith.constant 0 : i32
    %c0_i32_0 = arith.constant 0 : i32
    %c0_i32_1 = arith.constant 0 : i32
    return %c0_i32, %c0_i32_0 : i32, i32
  }
  func.func @transform_5(%arg0: i32) -> (i32, i32) {
    %c0_i32 = arith.constant 0 : i32
    %c0_i32_0 = arith.constant 0 : i32
    %c0_i32_1 = arith.constant 0 : i32
    return %c0_i32, %c0_i32_0 : i32, i32
  }
  func.func @transform_6(%arg0: i32) -> (i32, i32) {
    %c0_i32 = arith.constant 0 : i32
    %c0_i32_0 = arith.constant 0 : i32
    %c0_i32_1 = arith.constant 0 : i32
    return %c0_i32, %c0_i32_0 : i32, i32
  }
  func.func @transform_7(%arg0: i32) -> (i32, i32) {
    %c0_i32 = arith.constant 0 : i32
    %c0_i32_0 = arith.constant 0 : i32
    %c0_i32_1 = arith.constant 0 : i32
    return %c0_i32, %c0_i32_0 : i32, i32
  }
  func.func @transform_8(%arg0: i32) -> (i32, i32) {
    %c0_i32 = arith.constant 0 : i32
    %c0_i32_0 = arith.constant 0 : i32
    %c0_i32_1 = arith.constant 0 : i32
    return %c0_i32, %c0_i32_0 : i32, i32
  }
  func.func @transform_9(%arg0: i32) -> (i32, i32) {
    %c0_i32 = arith.constant 0 : i32
    %c0_i32_0 = arith.constant 0 : i32
    return %arg0, %c0_i32 : i32, i32
  }
}

</mosaic_0001>

<bundles_post_ra>
// kernel: actor_critic_forward.1
= control target key start
LH: loop header
LB: loop body
LE: loop exit
PB: predicated region body
PF: predicated region fallthrough
CT: control target
= control target key end

     0   :  { %14 = vsyncpa [#allocation3], 0  ;;  %s1265_s0 = inlined_call_operand.vmem [shape: f32[8,32], index: 0, kind: input, shape index: {}]   ;;  %s1266_s1 = inlined_call_operand.hbm [shape: bf16[32,512], index: 1, kind: input, shape index: {}]   ;;  %s1267_s2 = inlined_call_operand.vmem [shape: f32[1,512], index: 2, kind: input, shape index: {}]   ;;  %s1268_s3 = inlined_call_operand.hbm [shape: bf16[256,128], index: 3, kind: input, shape index: {}]   ;;  %s1269_s4 = inlined_call_operand.hbm [shape: bf16[256,128], index: 4, kind: input, shape index: {}]   ;;  %s1270_s5 = inlined_call_operand.vmem [shape: f32[1,256], index: 5, kind: input, shape index: {}]   ;;  %s1271_s6 = inlined_call_operand.hbm [shape: bf16[128,128], index: 6, kind: input, shape index: {}]   ;;  %s1272_s7 = inlined_call_operand.hbm [shape: bf16[128,128], index: 7, kind: input, shape index: {}]   ;;  %s1273_s8 = inlined_call_operand.vmem [shape: f32[1,128], index: 8, kind: input, shape index: {}]   ;;  %s1274_s9 = inlined_call_operand.vmem [shape: bf16[8,128], index: 9, kind: output, shape index: {}]  }
   0x1   :  { %15 = vsyncpa [#allocation5], 0  ;;  %s38_s11 = sshll.u32 %s1268_s3, 4  ;;  %s39_s11 = int_to_ptr.hbm [resolvable:$true] %s38_s11 }
   0x2   :  { %16 = vsyncpa [#allocation8], 0  ;;  %s1157_s12 = smov [#allocation4]   ;;  %s66_s16 = sshll.u32 %s1271_s6, 4  ;;  %s67_s16 = int_to_ptr.hbm [resolvable:$true] %s66_s16 }
   0x3   :  { %s40_s13 = sshll.u32 %s1157_s12, 4  ;;  %s1158_s17 = smov 64   ;;  %s41_s13 = int_to_ptr.vmem [resolvable:$true] %s40_s13 }
   0x4   :  { %s1159_s18 = smov 4   ;;  %s1160_s19 = smov [#allocation7]  }
   0x5   :  { %46 = dma.hbm_to_vmem [thread:$0]  %s39_s11, 2048, %s41_s13, [#allocation5], %s1158_s17, %s1158_s17, %s1159_s18  }
   0x6   :  { %s68_s20 = sshll.u32 %s1160_s19, 4  ;;  %s23_s22 = sshll.u32 %s1266_s1, 4  ;;  %s69_s20 = int_to_ptr.vmem [resolvable:$true] %s68_s20  ;;  %s24_s22 = int_to_ptr.hbm [resolvable:$true] %s23_s22 }
   0x7   :  { %74 = dma.hbm_to_vmem [thread:$0]  %s67_s16, 1024, %s69_s20, [#allocation8], %s1158_s17, %s1158_s17, %s1159_s18  }
   0x8   :  { %s1161_s6 = smov [#allocation2]   ;;  %s51_s26 = sshll.u32 %s1269_s4, 4  ;;  %s52_s26 = int_to_ptr.hbm [resolvable:$true] %s51_s26 }
   0x9   :  { %s25_s23 = sshll.u32 %s1161_s6, 4  ;;  %s1162_s27 = smov 256   ;;  %s26_s23 = int_to_ptr.vmem [resolvable:$true] %s25_s23 }
   0xa   :  { %s1163_s28 = smov 16   ;;  %s1164_s29 = smov [#allocation6]  }
   0xb   :  { %31 = dma.hbm_to_vmem [thread:$0]  %s24_s22, 1024, %s26_s23, [#allocation3], %s1162_s27, %s1162_s27, %s1163_s28  }
   0xc   :  { %s53_s30 = sshll.u32 %s1164_s29, 4  ;;  %s79_s11 = sshll.u32 %s1272_s7, 4  ;;  %s54_s30 = int_to_ptr.vmem [resolvable:$true] %s53_s30  ;;  %s80_s11 = int_to_ptr.hbm [resolvable:$true] %s79_s11 }
   0xd   :  { %59 = dma.hbm_to_vmem [thread:$0]  %s52_s26, 2048, %s54_s30, [#allocation5], %s1158_s17, %s1158_s17, %s1159_s18  }
   0xe   :  { %s1165_s12 = smov [#allocation9]  }
   0xf   :  { %s81_s13 = sshll.u32 %s1165_s12, 4  ;;  %s82_s13 = int_to_ptr.vmem [resolvable:$true] %s81_s13 }
  0x10   :  { %87 = dma.hbm_to_vmem [thread:$0]  %s80_s11, 1024, %s82_s13, [#allocation8], %s1158_s17, %s1158_s17, %s1159_s18  }
  0x11   :  { %1151 = dma.done.wait [#allocation3], 1024  }
  0x12   :  { %1152 = vsyncadd [#allocation3], 4294966272 }
  0x13   :  { %1153 = dma.done.wait [#allocation5], 4096  }
  0x14   :  { %1154 = vsyncadd [#allocation5], 4294963200 }
  0x15   :  { %1155 = dma.done.wait [#allocation8], 2048  }
  0x16   :  { %1156 = vsyncadd [#allocation8], 4294965248  ;;  %v753_v0 = vld [vmem:[#allocation2 + $0x20] sm:$0xf]  ;;  %v969_v1 = vld [vmem:[#allocation2 + $0x2c] sm:$0xf0] }
  0x17   :  { %v967_v2 = vld [vmem:[#allocation2 + $0x24] sm:$0xf]  ;;  %v754_v3 = vor.u32 %v969_v1, %v753_v0  ;;  %v755_v4 = vld [vmem:[#allocation2 + $0x30] sm:$0xf0]  ;;  %v737_v5 = vld [vmem:[#allocation2] sm:$0xf] }
  0x18   :  { %v965_v6 = vld [vmem:[#allocation2 + $0xc] sm:$0xf0]  ;;  %v758_v7 = vor.u32 %v967_v2, %v755_v4  ;;  %v963_v8 = vld [vmem:[#allocation2 + $0x4] sm:$0xf]  ;;  %v739_v9 = vld [vmem:[#allocation2 + $0x10] sm:$0xf0] }
  0x19   :  { %v111_v10 = vld [vmem:[%s1265_s0] sm:$0xff]  ;;  %181 = vmatpush.bf16.msra.mxu2 %v754_v3  ;;  %v738_v11 = vor.u32 %v965_v6, %v737_v5  ;;  %v761_v12 = vld [vmem:[#allocation2 + $0x28] sm:$0xf]  ;;  %v970_v13 = vld [vmem:[#allocation2 + $0x34] sm:$0xf0]  ;;  %v742_v15 = vor.u32 %v963_v8, %v739_v9  ;;  %vm171_vm0 = vcmask 261120  }
  0x1a   :  { %v968_v14 = vld [vmem:[#allocation2 + $0x2c] sm:$0xf]  ;;  %194 = vmatpush.bf16.msra.mxu3 %v758_v7  ;;  %v762_v16 = vor.u32 %v970_v13, %v761_v12  ;;  %v763_v17 = vld [vmem:[#allocation2 + $0x38] sm:$0xf0]  ;;  %v745_v19 = vld [vmem:[#allocation2 + $0x8] sm:$0xf]  ;;  %v112_v22 = vpack.c.bf16 %v111_v10, %v111_v10 }
  0x1b   :  { %v766_v18 = vor.u32 %v968_v14, %v763_v17  ;;  %v966_v20 = vld [vmem:[#allocation2 + $0x14] sm:$0xf0]  ;;  %v964_v23 = vld [vmem:[#allocation2 + $0xc] sm:$0xf]  ;;  %v747_v24 = vld [vmem:[#allocation2 + $0x18] sm:$0xf0] }
  0x1c   :  { %v978_v21 = vld [vmem:[#allocation4 + $0x38] sm:$0xff]  ;;  %v977_v26 = vld [vmem:[#allocation4 + $0x30] sm:$0xff]  ;;  %v746_v27 = vor.u32 %v966_v20, %v745_v19  ;;  %v750_v28 = vor.u32 %v964_v23, %v747_v24  ;;  %v976_v32 = vld [vmem:[#allocation4 + $0x28] sm:$0xff] }
  0x1d   :  { %v986_v25 = vld [vmem:[#allocation4 + $0x78] sm:$0xff]  ;;  %182 = vmatpush.bf16.msra.mxu2 %v738_v11  ;;  %372 = vmatpush.bf16.msra.mxu0 %v978_v21  ;;  %v985_v29 = vld [vmem:[#allocation4 + $0x70] sm:$0xff]  ;;  %v984_v33 = vld [vmem:[#allocation4 + $0x68] sm:$0xff] }
  0x1e   :  { %195 = vmatpush.bf16.msra.mxu3 %v742_v15  ;;  %385 = vmatpush.bf16.msra.mxu1 %v986_v25  ;;  %v994_v30 = vld [vmem:[#allocation6 + $0x38] sm:$0xff]  ;;  %v975_v34 = vld [vmem:[#allocation4 + $0x20] sm:$0xff]  ;;  %v973_v38 = vld [vmem:[#allocation4 + $0x10] sm:$0xff] }
  0x1f   :  { %v1002_v31 = vld [vmem:[#allocation6 + $0x78] sm:$0xff]  ;;  %v983_v35 = vld [vmem:[#allocation4 + $0x60] sm:$0xff]  ;;  %v981_v39 = vld [vmem:[#allocation4 + $0x50] sm:$0xff] }
  0x20   :  { %767 = vmatmul.msk.bf16.vlgmr.msra.gmra.mxu2 %vm171_vm0, %v112_v22  ;;  %v974_v36 = vld [vmem:[#allocation4 + $0x18] sm:$0xff]  ;;  %v993_v40 = vld [vmem:[#allocation6 + $0x30] sm:$0xff]  ;;  %v972_v42 = vld [vmem:[#allocation4 + $0x8] sm:$0xff] }
  0x21   :  { %207 = vmatpush.bf16.msrb.mxu2 %v762_v16  ;;  %768 = vmatmul.msk.bf16.vlgmr.msra.gmra.mxu3 %vm171_vm0, %v112_v22  ;;  %v982_v37 = vld [vmem:[#allocation4 + $0x58] sm:$0xff]  ;;  %v1001_v41 = vld [vmem:[#allocation6 + $0x70] sm:$0xff]  ;;  %v980_v43 = vld [vmem:[#allocation4 + $0x48] sm:$0xff] }
  0x22   :  { %220 = vmatpush.bf16.msrb.mxu3 %v766_v18  ;;  %373 = vmatpush.bf16.msra.mxu0 %v977_v26  ;;  %v992_v44 = vld [vmem:[#allocation6 + $0x28] sm:$0xff]  ;;  %v971_v46 = vld [vmem:[#allocation4] sm:$0xff]  ;;  %v990_v50 = vld [vmem:[#allocation6 + $0x18] sm:$0xff] }
  0x23   :  { %386 = vmatpush.bf16.msra.mxu1 %v985_v29  ;;  %v1000_v45 = vld [vmem:[#allocation6 + $0x68] sm:$0xff]  ;;  %v979_v47 = vld [vmem:[#allocation4 + $0x40] sm:$0xff]  ;;  %v998_v51 = vld [vmem:[#allocation6 + $0x58] sm:$0xff] }
  0x24   :  { %v991_v48 = vld [vmem:[#allocation6 + $0x20] sm:$0xff]  ;;  %v989_v52 = vld [vmem:[#allocation6 + $0x10] sm:$0xff]  ;;  %v988_v54 = vld [vmem:[#allocation6 + $0x8] sm:$0xff] }
  0x25   :  { %208 = vmatpush.bf16.msrb.mxu2 %v746_v27  ;;  %v999_v49 = vld [vmem:[#allocation6 + $0x60] sm:$0xff]  ;;  %v997_v53 = vld [vmem:[#allocation6 + $0x50] sm:$0xff]  ;;  %v996_v55 = vld [vmem:[#allocation6 + $0x48] sm:$0xff] }
  0x26   :  { %221 = vmatpush.bf16.msrb.mxu3 %v750_v28  ;;  %374 = vmatpush.bf16.msra.mxu0 %v976_v32  ;;  %v987_v56 = vld [vmem:[#allocation6] sm:$0xff]  ;;  %v1010_v59 = vld [vmem:[#allocation7 + $0x38] sm:$0xff]  ;;  %v1009_v62 = vld [vmem:[#allocation7 + $0x30] sm:$0xff] }
  0x27   :  { %387 = vmatpush.bf16.msra.mxu1 %v984_v33  ;;  %v995_v57 = vld [vmem:[#allocation6 + $0x40] sm:$0xff]  ;;  %v1008_v3 = vld [vmem:[#allocation7 + $0x28] sm:$0xff]  ;;  %v1006_v14 = vld [vmem:[#allocation7 + $0x18] sm:$0xff] }
  0x28   :  { %v121_v58 = vld [vmem:[%s1267_s2] sm:$0xf]  ;;  %v1005_v17 = vld [vmem:[#allocation7 + $0x10] sm:$0xff]  ;;  %v1004_v32 = vld [vmem:[#allocation7 + $0x8] sm:$0xff] }
  0x29   :  { %537 = vmatpush.bf16.msra.mxu2 %v994_v30  ;;  %v123_v60 = vperm.slane %v121_v58, 0  ;;  %v124_v61 = vperm.slane %v121_v58, 1  ;;  %v1007_v7 = vld [vmem:[#allocation7 + $0x20] sm:$0xff]  ;;  %v125_v15 = vperm.slane %v121_v58, 2  ;;  %v126_v16 = vperm.slane %v121_v58, 3  ;;  %v1017_v33 = vld [vmem:[#allocation9 + $0x30] sm:$0xff] }
  0x2a   :  { %550 = vmatpush.bf16.msra.mxu3 %v1002_v31  ;;  %375 = vmatpush.bf16.msra.mxu0 %v975_v34  ;;  %v1018_v31 = vld [vmem:[#allocation9 + $0x38] sm:$0xff]  ;;  %v1003_v34 = vld [vmem:[#allocation7] sm:$0xff] }
  0x2b   :  { %388 = vmatpush.bf16.msra.mxu1 %v983_v35  ;;  %v1016_v35 = vld [vmem:[#allocation9 + $0x28] sm:$0xff] }
  0x2d   :  { %538 = vmatpush.bf16.msra.mxu2 %v993_v40  ;;  %v1011_v40 = vld [vmem:[#allocation9] sm:$0xff] }
  0x2e   :  { %376 = vmatpush.bf16.msra.mxu0 %v974_v36  ;;  %551 = vmatpush.bf16.msra.mxu3 %v1001_v41  ;;  %v1015_v36 = vld [vmem:[#allocation9 + $0x20] sm:$0xff] }
  0x2f   :  { %389 = vmatpush.bf16.msra.mxu1 %v982_v37  ;;  %v1014_v37 = vld [vmem:[#allocation9 + $0x18] sm:$0xff]  ;;  %v1028_v41 = vld [vmem:[%s1270_s5] ss:$0 sm:$0xff] }
  0x30   :  { %769 = vmatmul.msk.bf16.vlgmr.msrb.gmra.mxu2 %vm171_vm0, %v112_v22 }
  0x31   :  { %770 = vmatmul.msk.bf16.vlgmr.msrb.gmra.mxu3 %vm171_vm0, %v112_v22  ;;  %539 = vmatpush.bf16.msra.mxu2 %v992_v44 }
  0x32   :  { %377 = vmatpush.bf16.msra.mxu0 %v973_v38  ;;  %552 = vmatpush.bf16.msra.mxu3 %v1000_v45  ;;  %v1013_v38 = vld [vmem:[#allocation9 + $0x10] sm:$0xff] }
  0x33   :  { %390 = vmatpush.bf16.msra.mxu1 %v981_v39  ;;  %v1012_v39 = vld [vmem:[#allocation9 + $0x8] sm:$0xff] }
  0x35   :  { %540 = vmatpush.bf16.msra.mxu2 %v991_v48 }
  0x36   :  { %378 = vmatpush.bf16.msra.mxu0 %v972_v42  ;;  %553 = vmatpush.bf16.msra.mxu3 %v999_v49 }
  0x37   :  { %391 = vmatpush.bf16.msra.mxu1 %v980_v43 }
  0x39   :  { %541 = vmatpush.bf16.msra.mxu2 %v990_v50  ;;  %v1029_v50 = vld [vmem:[%s1270_s5 + $0x1] ss:$0 sm:$0xff] }
  0x3a   :  { %379 = vmatpush.bf16.msra.mxu0 %v971_v46  ;;  %554 = vmatpush.bf16.msra.mxu3 %v998_v51 }
  0x3b   :  { %392 = vmatpush.bf16.msra.mxu1 %v979_v47 }
  0x3d   :  { %542 = vmatpush.bf16.msra.mxu2 %v989_v52 }
  0x3e   :  { %555 = vmatpush.bf16.msra.mxu3 %v997_v53  ;;  %647 = vmatpush.bf16.msrb.mxu0 %v1018_v31 }
  0x3f   :  { %708 = vmatpush.bf16.msrb.mxu1 %v1010_v59 }
  0x41   :  { %543 = vmatpush.bf16.msra.mxu2 %v988_v54 }
  0x42   :  { %556 = vmatpush.bf16.msra.mxu3 %v996_v55  ;;  %648 = vmatpush.bf16.msrb.mxu0 %v1017_v33 }
  0x43   :  { %709 = vmatpush.bf16.msrb.mxu1 %v1009_v62 }
  0x45   :  { %544 = vmatpush.bf16.msra.mxu2 %v987_v56 }
  0x46   :  { %557 = vmatpush.bf16.msra.mxu3 %v995_v57  ;;  %649 = vmatpush.bf16.msrb.mxu0 %v1016_v35 }
  0x47   :  { %710 = vmatpush.bf16.msrb.mxu1 %v1008_v3 }
  0x4a   :  { %650 = vmatpush.bf16.msrb.mxu0 %v1015_v36 }
  0x4b   :  { %711 = vmatpush.bf16.msrb.mxu1 %v1007_v7 }
  0x4e   :  { %651 = vmatpush.bf16.msrb.mxu0 %v1014_v37 }
  0x4f   :  { %712 = vmatpush.bf16.msrb.mxu1 %v1006_v14 }
  0x52   :  { %652 = vmatpush.bf16.msrb.mxu0 %v1013_v38 }
  0x53   :  { %713 = vmatpush.bf16.msrb.mxu1 %v1005_v17 }
  0x56   :  { %653 = vmatpush.bf16.msrb.mxu0 %v1012_v39 }
  0x57   :  { %714 = vmatpush.bf16.msrb.mxu1 %v1004_v32 }
  0x5a   :  { %654 = vmatpush.bf16.msrb.mxu0 %v1011_v40 }
  0x5b   :  { %715 = vmatpush.bf16.msrb.mxu1 %v1003_v34 }
  0xa3   :  { %v184_v63 = vpop.f32.mrf.mxu2 }
  0xa4   :  { %v185_v0 = vadd.f32 %v184_v63, %v123_v60  ;;  %v197_v1 = vpop.f32.mrf.mxu3 }
  0xa5   :  { %v198_v2 = vadd.f32 %v197_v1, %v124_v61  ;;  %v1030_v61 = vld [vmem:[%s1273_s8] ss:$0 sm:$0xff] }
  0xa6   :  { %v227_v4 = vmax.f32 %v185_v0, 0.0 }
  0xa7   :  { %v228_v5 = vmax.f32 %v198_v2, 0.0 }
  0xa9   :  { %v231_v6 = vpack.c.bf16 %v228_v5, %v227_v4 }
  0xab   :  { %v186_v8 = vpop.f32.mrf.mxu2  ;;  %v270_v9 = vunpack.c.l.b16 %v231_v6  ;;  %v271_v10 = vunpack.c.h.b16 %v231_v6 }
  0xac   :  { %v199_v11 = vpop.f32.mrf.mxu3 }
  0xad   :  { %v272_v12 = vpack.c.b16 %v270_v9, %v270_v9  ;;  %v273_v13 = vpack.c.b16 %v271_v10, %v271_v10 }
  0xaf   :  { %380 = vmatmul.bf16.vlgmr.msra.gmra.mxu0 %v272_v12  ;;  %393 = vmatmul.bf16.vlgmr.msra.gmra.mxu1 %v273_v13 }
  0xb3   :  { %v210_v18 = vpop.f32.mrf.mxu2 }
  0xb4   :  { %v211_v19 = vadd.f32 %v210_v18, %v125_v15  ;;  %v223_v20 = vpop.f32.mrf.mxu3 }
  0xb5   :  { %v224_v21 = vadd.f32 %v223_v20, %v126_v16 }
  0xb6   :  { %v229_v22 = vmax.f32 %v211_v19, 0.0 }
  0xb7   :  { %v230_v23 = vmax.f32 %v224_v21, 0.0 }
  0xb9   :  { %v232_v24 = vpack.c.bf16 %v230_v23, %v229_v22 }
  0xbb   :  { %v435_v25 = vunpack.c.l.b16 %v232_v24  ;;  %v436_v26 = vunpack.c.h.b16 %v232_v24  ;;  %v212_v27 = vpop.f32.mrf.mxu2 }
  0xbc   :  { %v225_v28 = vpop.f32.mrf.mxu3 }
  0xbd   :  { %v437_v29 = vpack.c.b16 %v435_v25, %v435_v25  ;;  %v438_v30 = vpack.c.b16 %v436_v26, %v436_v26 }
  0xbf   :  { %545 = vmatmul.bf16.vlgmr.msra.gmra.mxu2 %v437_v29  ;;  %558 = vmatmul.bf16.vlgmr.msra.gmra.mxu3 %v438_v30 }
 0x12c   :  { %v381_v42 = vpop.f32.mrf.mxu0  ;;  %v394_v43 = vpop.f32.mrf.mxu1 }
 0x12d   :  { %v382_v44 = vadd.f32 %v1028_v41, %v381_v42 }
 0x12f   :  { %v395_v45 = vadd.f32 %v394_v43, %v382_v44 }
 0x131   :  { %v563_v46 = vmax.f32 %v395_v45, 0.0 }
 0x133   :  { %v564_v47 = vpack.c.bf16 %v563_v46, %v563_v46 }
 0x134   :  { %v383_v48 = vpop.f32.mrf.mxu0  ;;  %v396_v49 = vpop.f32.mrf.mxu1 }
 0x135   :  { %716 = vmatmul.bf16.vlgmr.msrb.gmra.mxu1 %v564_v47 }
 0x142   :  { %v546_v51 = vpop.f32.mrf.mxu2  ;;  %v559_v52 = vpop.f32.mrf.mxu3 }
 0x143   :  { %v547_v53 = vadd.f32 %v1029_v50, %v546_v51 }
 0x145   :  { %v560_v54 = vadd.f32 %v559_v52, %v547_v53 }
 0x147   :  { %v565_v55 = vmax.f32 %v560_v54, 0.0 }
 0x149   :  { %v566_v56 = vpack.c.bf16 %v565_v55, %v565_v55 }
 0x14a   :  { %v548_v57 = vpop.f32.mrf.mxu2  ;;  %v561_v58 = vpop.f32.mrf.mxu3 }
 0x14b   :  { %655 = vmatmul.bf16.vlgmr.msrb.gmra.mxu0 %v566_v56 }
 0x1b2   :  { %v717_v59 = vpop.f32.mrf.mxu1 }
 0x1ba   :  { %v719_v60 = vpop.f32.mrf.mxu1 }
 0x1c8   :  { %v656_v62 = vpop.f32.mrf.mxu0 }
 0x1c9   :  { %v718_v63 = vadd.f32 %v717_v59, %v656_v62 }
 0x1cb   :  { %v725_v0 = vadd.f32 %v1030_v61, %v718_v63 }
 0x1cd   :  { %v726_v1 = vpack.c.bf16 %v725_v0, %v725_v0 }
 0x1cf   :  { %727 = vst [vmem:[%s1274_s9] sm:$0xf] %v726_v1 }
 0x1d0   :  { %v658_v2 = vpop.f32.mrf.mxu0 }
 0x1d1   :  { %732 = vsyncpa [#allocation3], 1 }
 0x1d2   :  { %733 = vsyncpa [#allocation5], 1 }
 0x1d3   :  { %734 = vsyncpa [#allocation8], 1 }

</bundles_post_ra>
